<compile_context>
chip_gen: v5e
topology: v5e:2x2
jax: 0.10.0
libtpu: 0.0.40
codegen_flags: <defaults>
</compile_context>

<pallas_src>
import jax
import jax.numpy as jnp
import numpy as np
from jax.experimental import pallas as pl
from jax.experimental.pallas import tpu as pltpu


# --------------------------------------------------------------------------
# Fused kernel: whole decoder for one batch sample (one grid program).
# --------------------------------------------------------------------------
def _decoder_kernel(x_ref, w1_ref, b1_ref, w2_ref, b2_ref, w3_ref, b3_ref,
                    w4_ref, b4_ref, o_ref):
    """Activation layout: rows = coarse spatial position `a`,
    columns = (phase, channel) packed as phase*C + c.  In this layout each
    transposed convolution is one matmul with a pre-packed polyphase weight:

      layer 1 (K=3,S=2,op=1): [x[a] | x[a-1]]   (L0+1, 2E)  @ w1p (2E, 2H)
      layer 2 (K=3,S=2)     : [y1[a] | y1[a-1]] (L0+2, 4H)  @ w2p (4H, 4H)
      layer 3 (K=4,S=4)     : y2                (L0+2, 4H)  @ w3p (4H, 16H)
      layer 4 (K=4,S=4)     : y3                (L0+2, 16H) @ w4p (16H, 64*out)

    Row a of the result holds output positions [64a, 64a+64); the wrapper
    flattens rows and slices off the (bias-only) tail past the true length.
    """
    f32, bf16 = jnp.float32, jnp.bfloat16

    # ---- layer 1: ConvTranspose1d(E->H, K=3, S=2, output_padding=1) + ReLU
    h = jnp.dot(x_ref[0], w1_ref[...], preferred_element_type=f32)
    h = jnp.maximum(h + b1_ref[...], 0.0)                       # (L0+1, 2H)

    # ---- layer 2: ConvTranspose1d(H->H, K=3, S=2) + ReLU
    # Needs y1 at coarse rows a and a-1 -> pad one zero row at each end.
    zrow = jnp.zeros((1, h.shape[1]), f32)
    h_cur = jnp.concatenate([h, zrow], axis=0)                  # y1[a]   (L0+2, 2H)
    h_prev = jnp.concatenate([zrow, h], axis=0)                 # y1[a-1] (L0+2, 2H)
    hcat = jnp.concatenate([h_cur, h_prev], axis=1).astype(bf16)
    h = jnp.dot(hcat, w2_ref[...], preferred_element_type=f32)
    h = jnp.maximum(h + b2_ref[...], 0.0)                       # (L0+2, 4H)

    # ---- layer 3: ConvTranspose1d(H->H, K=4, S=4) + ReLU  (stride == kernel)
    h = jnp.dot(h.astype(bf16), w3_ref[...], preferred_element_type=f32)
    h = jnp.maximum(h + b3_ref[...], 0.0)                       # (L0+2, 16H)

    # ---- layer 4: ConvTranspose1d(H->out, K=4, S=4), no ReLU
    h = jnp.dot(h.astype(bf16), w4_ref[...], preferred_element_type=f32)
    o_ref[0] = (h + b4_ref[...]).astype(o_ref.dtype)            # (L0+2, 64*out)


# --------------------------------------------------------------------------
# Weight packing (pure layout prep, done once per parameter set)
# --------------------------------------------------------------------------
def _block_diag(block, n):
    """Block-diagonal matrix with `n` copies of `block` on the diagonal."""
    r, c = block.shape
    out = jnp.zeros((n * r, n * c), block.dtype)
    for i in range(n):
        out = out.at[i * r:(i + 1) * r, i * c:(i + 1) * c].set(block)
    return out


def prepare_decoder_params(params, *, kernel_size, stride_size):
    """Pack PyTorch-layout ConvTranspose1d weights (C_in, C_out, K) into the
    per-layer polyphase matmul matrices used by the kernel."""
    # TODO(synk): polyphase packing below is specialised to the
    # kernel_size=3 / stride_size=2 configuration exercised by this model.
    assert kernel_size == 3 and stride_size == 2, "specialised to K=3, S=2"
    f32, bf16 = jnp.float32, jnp.bfloat16

    w1 = params["w1"].astype(f32); b1 = params["b1"].astype(f32)   # (E, H, 3)
    w2 = params["w2"].astype(f32); b2 = params["b2"].astype(f32)   # (H, H, 3)
    w3 = params["w3"].astype(f32); b3 = params["b3"].astype(f32)   # (H, H, 4)
    w6 = params["w6"].astype(f32); b6 = params["b6"].astype(f32)   # (H, out, 4)
    e_dim, h_dim, _ = w1.shape

    # Layer 1: y1[2a]   = x[a]@W0 + x[a-1]@W2 ;  y1[2a+1] = x[a]@W1
    # rows = [x[a] ch | x[a-1] ch], cols = [phase 0 | phase 1].
    z_eh = jnp.zeros((e_dim, h_dim), f32)
    w1p = jnp.concatenate([
        jnp.concatenate([w1[:, :, 0], w1[:, :, 1]], axis=1),
        jnp.concatenate([w1[:, :, 2], z_eh], axis=1),
    ], axis=0)                                                     # (2E, 2H)
    b1p = jnp.tile(b1, 2)[None, :]

    # Layer 2: output sub-phases p=0..3 of y2[4a+p] in terms of y1 phases at
    # coarse rows a and a-1:
    #   p0 = y1[2a]@W0   + y1[2a-1]@W2
    #   p1 = y1[2a]@W1
    #   p2 = y1[2a+1]@W0 + y1[2a]@W2
    #   p3 = y1[2a+1]@W1
    # rows = [y1[2a] | y1[2a+1] | y1[2a-2] | y1[2a-1]]  (matches hcat layout).
    z_hh = jnp.zeros((h_dim, h_dim), f32)
    W0, W1, W2 = (w2[:, :, k] for k in range(3))
    w2p = jnp.concatenate([
        jnp.concatenate([W0,   W1,   W2,   z_hh], axis=1),
        jnp.concatenate([z_hh, z_hh, W0,   W1],   axis=1),
        jnp.concatenate([z_hh, z_hh, z_hh, z_hh], axis=1),   # y1[2a-2]: unused
        jnp.concatenate([W2,   z_hh, z_hh, z_hh], axis=1),
    ], axis=0)                                                     # (4H, 4H)
    b2p = jnp.tile(b2, 4)[None, :]

    # Layers 3 & 4: stride == kernel_size, so each input phase p maps
    # independently onto output phases 4p..4p+3 -> small block-diagonal pack.
    wph3 = jnp.concatenate([w3[:, :, k] for k in range(4)], axis=1)  # (H, 4H)
    w3p = _block_diag(wph3, 4)                                       # (4H, 16H)
    b3p = jnp.tile(b3, 16)[None, :]

    wph4 = jnp.concatenate([w6[:, :, k] for k in range(4)], axis=1)  # (H, 4*out)
    w4p = _block_diag(wph4, 16)                                      # (16H, 64*out)
    b4p = jnp.tile(b6, 64)[None, :]

    return dict(w1p=w1p.astype(bf16), b1p=b1p,
                w2p=w2p.astype(bf16), b2p=b2p,
                w3p=w3p.astype(bf16), b3p=b3p,
                w4p=w4p.astype(bf16), b4p=b4p)


# --------------------------------------------------------------------------
# Forward wrapper: single pallas_call with a parallel batch grid
# --------------------------------------------------------------------------
@jax.jit
def decoder_forward(packed, x):
    """x: (B, E, L0) float32  ->  (B, output_dim, L4) float32."""
    B, e_dim, l0 = x.shape
    ups = 64                                       # total upsampling 2*2*4*4
    out_dim = packed["b4p"].shape[1] // ups
    l1 = (l0 - 1) * 2 + 3 + 1                      # deconv1 (output_padding=1)
    l2 = (l1 - 1) * 2 + 3                          # deconv2
    l3 = (l2 - 1) * 4 + 4                          # deconv3
    l4 = (l3 - 1) * 4 + 4                          # deconv6
    rows = l0 + 2                                  # coarse rows carried in-kernel

    # Layer-1 polyphase input, built once outside the kernel:
    # row a holds [x[a] channels | x[a-1] channels] (zeros out of range).
    x_t = jnp.transpose(x, (0, 2, 1)).astype(jnp.bfloat16)        # (B, L0, E)
    x_cur = jnp.pad(x_t, ((0, 0), (0, 1), (0, 0)))                # x[a]
    x_prev = jnp.pad(x_t, ((0, 0), (1, 0), (0, 0)))               # x[a-1]
    x1cat = jnp.concatenate([x_cur, x_prev], axis=2)              # (B, L0+1, 2E)

    def full2d(a):
        return pl.BlockSpec(a.shape, lambda b: (0, 0))            # batch-shared

    yp = pl.pallas_call(
        _decoder_kernel,
        grid=(B,),
        in_specs=[
            pl.BlockSpec((1, l0 + 1, 2 * e_dim), lambda b: (b, 0, 0)),
            full2d(packed["w1p"]), full2d(packed["b1p"]),
            full2d(packed["w2p"]), full2d(packed["b2p"]),
            full2d(packed["w3p"]), full2d(packed["b3p"]),
            full2d(packed["w4p"]), full2d(packed["b4p"]),
        ],
        out_specs=pl.BlockSpec((1, rows, ups * out_dim), lambda b: (b, 0, 0)),
        out_shape=jax.ShapeDtypeStruct((B, rows, ups * out_dim), jnp.float32),
        compiler_params=pltpu.CompilerParams(
            dimension_semantics=("parallel",),      # megacore split on v7x
            vmem_limit_bytes=16 * 1024 * 1024),     # tiny footprint, big headroom
    )(x1cat, packed["w1p"], packed["b1p"], packed["w2p"], packed["b2p"],
      packed["w3p"], packed["b3p"], packed["w4p"], packed["b4p"])

    # Row-major flatten interleaves the 64 per-row output positions; the tail
    # past the true output length is bias-only junk and is sliced off here.
    y = yp.reshape(B, rows * ups, out_dim)[:, :l4, :]
    return jnp.transpose(y, (0, 2, 1))


# --------------------------------------------------------------------------
# Pure-JAX reference (direct scatter-add definition of ConvTranspose1d)
# --------------------------------------------------------------------------
def conv_transpose1d_ref(x, w, b, *, stride, output_padding=0):
    B, C_in, L_in = x.shape
    _, C_out, K = w.shape
    L_out = (L_in - 1) * stride + K + output_padding
    u = jnp.einsum("bci,cok->bkoi", x, w)          # (B, K, C_out, L_in)
    y = jnp.zeros((B, C_out, L_out), jnp.float32)
    for k in range(K):
        y = y.at[:, :, k:k + stride * L_in:stride].add(u[:, k])
    return y + b[None, :, None]


def decoder_forward_ref(params, x, *, stride_size):
    x = jax.nn.relu(conv_transpose1d_ref(x, params["w1"], params["b1"],
                                         stride=stride_size, output_padding=1))
    x = jax.nn.relu(conv_transpose1d_ref(x, params["w2"], params["b2"],
                                         stride=stride_size))
    x = jax.nn.relu(conv_transpose1d_ref(x, params["w3"], params["b3"], stride=4))
    x = conv_transpose1d_ref(x, params["w6"], params["b6"], stride=4)
    return x


# --------------------------------------------------------------------------
if __name__ == "__main__":
    embedding_dim = 4
    hidden_dim = 32
    kernel_size = 3
    stride_size = 2
    output_dim = 1
    B, L_in = 2, 8

    key = jax.random.PRNGKey(0)
    ks = jax.random.split(key, 9)

    def init_w(k, shape):
        return jax.random.normal(k, shape, jnp.float32) * 0.1

    params = {
        # PyTorch ConvTranspose1d weight layout: (C_in, C_out, K)
        "w1": init_w(ks[0], (embedding_dim, hidden_dim, kernel_size)),
        "b1": init_w(ks[1], (hidden_dim,)),
        "w2": init_w(ks[2], (hidden_dim, hidden_dim, kernel_size)),
        "b2": init_w(ks[3], (hidden_dim,)),
        "w3": init_w(ks[4], (hidden_dim, hidden_dim, 4)),
        "b3": init_w(ks[5], (hidden_dim,)),
        "w6": init_w(ks[6], (hidden_dim, output_dim, 4)),
        "b6": init_w(ks[7], (output_dim,)),
    }
    x = jax.random.normal(ks[8], (B, embedding_dim, L_in), jnp.float32)

    # Weight packing hoisted out of the forward hot path (once per param set).
    packed = prepare_decoder_params(params, kernel_size=kernel_size,
                                    stride_size=stride_size)

    out = jax.block_until_ready(decoder_forward(packed, x))
    ref = jax.block_until_ready(decoder_forward_ref(params, x,
                                                    stride_size=stride_size))

    # Shape chain: L = 8 -> 18 -> 37 -> 148 -> 592
    assert out.shape == (B, output_dim, 592), out.shape
    # Kernel feeds bf16 operands to the MXU (f32 accumulation) per the perf
    # review, so the tolerance vs the pure-f32 reference is loosened.
    np.testing.assert_allclose(np.asarray(out), np.asarray(ref),
                               rtol=3e-2, atol=1e-2)

    print("KERNEL_OK")
</pallas_src>

<mosaic_0001>
module attributes {stable_mosaic.version = 11 : i64} {
  func.func @_decoder_kernel(%arg0: i32, %arg1: memref<1x9x8xbf16, #tpu.memory_space<vmem>>, %arg2: memref<8x64xbf16, #tpu.memory_space<vmem>>, %arg3: memref<1x64xf32, #tpu.memory_space<vmem>>, %arg4: memref<128x128xbf16, #tpu.memory_space<vmem>>, %arg5: memref<1x128xf32, #tpu.memory_space<vmem>>, %arg6: memref<128x512xbf16, #tpu.memory_space<vmem>>, %arg7: memref<1x512xf32, #tpu.memory_space<vmem>>, %arg8: memref<512x64xbf16, #tpu.memory_space<vmem>>, %arg9: memref<1x64xf32, #tpu.memory_space<vmem>>, %arg10: memref<1x10x64xf32, #tpu.memory_space<vmem>>) attributes {dimension_semantics = [#tpu.dimension_semantics<parallel>], iteration_bounds = array<i64: 2>, scalar_prefetch = 0 : i64, scratch_operands = 0 : i64, tpu.core_type = #tpu.core_type<tc>, window_params = [{transform_indices = @transform_0, window_bounds = array<i64: 1, 9, 8>}, {pipeline_mode = #tpu.pipeline_mode<synchronous>, transform_indices = @transform_1, window_bounds = array<i64: 8, 64>}, {pipeline_mode = #tpu.pipeline_mode<synchronous>, transform_indices = @transform_2, window_bounds = array<i64: 1, 64>}, {pipeline_mode = #tpu.pipeline_mode<synchronous>, transform_indices = @transform_3, window_bounds = array<i64: 128, 128>}, {pipeline_mode = #tpu.pipeline_mode<synchronous>, transform_indices = @transform_4, window_bounds = array<i64: 1, 128>}, {pipeline_mode = #tpu.pipeline_mode<synchronous>, transform_indices = @transform_5, window_bounds = array<i64: 128, 512>}, {pipeline_mode = #tpu.pipeline_mode<synchronous>, transform_indices = @transform_6, window_bounds = array<i64: 1, 512>}, {pipeline_mode = #tpu.pipeline_mode<synchronous>, transform_indices = @transform_7, window_bounds = array<i64: 512, 64>}, {pipeline_mode = #tpu.pipeline_mode<synchronous>, transform_indices = @transform_8, window_bounds = array<i64: 1, 64>}, {transform_indices = @transform_9, window_bounds = array<i64: 1, 10, 64>}]} {
    %c0 = arith.constant 0 : index
    %c0_0 = arith.constant 0 : index
    %c0_1 = arith.constant 0 : index
    %0 = vector.load %arg1[%c0, %c0_0, %c0_1] : memref<1x9x8xbf16, #tpu.memory_space<vmem>>, vector<1x9x8xbf16>
    %1 = vector.shape_cast %0 : vector<1x9x8xbf16> to vector<9x8xbf16>
    %c0_2 = arith.constant 0 : index
    %c0_3 = arith.constant 0 : index
    %2 = vector.load %arg2[%c0_2, %c0_3] : memref<8x64xbf16, #tpu.memory_space<vmem>>, vector<8x64xbf16>
    %cst = arith.constant dense<0.000000e+00> : vector<9x64xf32>
    %3 = tpu.matmul %1, %2, %cst {dimension_numbers = #tpu.dot_dimension_numbers<[1], [0], [0], [1], [0, 0, 1, 1], [], []>} : vector<9x8xbf16>, vector<8x64xbf16>, vector<9x64xf32> -> vector<9x64xf32>
    %c0_4 = arith.constant 0 : index
    %c0_5 = arith.constant 0 : index
    %4 = vector.load %arg3[%c0_4, %c0_5] : memref<1x64xf32, #tpu.memory_space<vmem>>, vector<1x64xf32>
    %5 = vector.broadcast %4 : vector<1x64xf32> to vector<9x64xf32>
    %6 = arith.addf %3, %5 : vector<9x64xf32>
    %cst_6 = arith.constant 0.000000e+00 : f32
    %7 = vector.broadcast %cst_6 : f32 to vector<9x64xf32>
    %8 = arith.maximumf %6, %7 : vector<9x64xf32>
    %cst_7 = arith.constant 0.000000e+00 : f32
    %9 = vector.broadcast %cst_7 : f32 to vector<1x64xf32>
    %10 = tpu.concatenate %8, %9 in 0 : vector<9x64xf32>, vector<1x64xf32> -> vector<10x64xf32>
    %11 = tpu.concatenate %9, %8 in 0 : vector<1x64xf32>, vector<9x64xf32> -> vector<10x64xf32>
    %12 = tpu.concatenate %10, %11 in 1 : vector<10x64xf32>, vector<10x64xf32> -> vector<10x128xf32>
    %13 = arith.truncf %12 : vector<10x128xf32> to vector<10x128xbf16>
    %c0_8 = arith.constant 0 : index
    %c0_9 = arith.constant 0 : index
    %14 = vector.load %arg4[%c0_8, %c0_9] : memref<128x128xbf16, #tpu.memory_space<vmem>>, vector<128x128xbf16>
    %cst_10 = arith.constant dense<0.000000e+00> : vector<10x128xf32>
    %15 = tpu.matmul %13, %14, %cst_10 {dimension_numbers = #tpu.dot_dimension_numbers<[1], [0], [0], [1], [0, 0, 1, 1], [], []>} : vector<10x128xbf16>, vector<128x128xbf16>, vector<10x128xf32> -> vector<10x128xf32>
    %c0_11 = arith.constant 0 : index
    %c0_12 = arith.constant 0 : index
    %16 = vector.load %arg5[%c0_11, %c0_12] : memref<1x128xf32, #tpu.memory_space<vmem>>, vector<1x128xf32>
    %17 = vector.broadcast %16 : vector<1x128xf32> to vector<10x128xf32>
    %18 = arith.addf %15, %17 : vector<10x128xf32>
    %cst_13 = arith.constant 0.000000e+00 : f32
    %19 = vector.broadcast %cst_13 : f32 to vector<10x128xf32>
    %20 = arith.maximumf %18, %19 : vector<10x128xf32>
    %21 = arith.truncf %20 : vector<10x128xf32> to vector<10x128xbf16>
    %c0_14 = arith.constant 0 : index
    %c0_15 = arith.constant 0 : index
    %22 = vector.load %arg6[%c0_14, %c0_15] : memref<128x512xbf16, #tpu.memory_space<vmem>>, vector<128x512xbf16>
    %cst_16 = arith.constant dense<0.000000e+00> : vector<10x512xf32>
    %23 = tpu.matmul %21, %22, %cst_16 {dimension_numbers = #tpu.dot_dimension_numbers<[1], [0], [0], [1], [0, 0, 1, 1], [], []>} : vector<10x128xbf16>, vector<128x512xbf16>, vector<10x512xf32> -> vector<10x512xf32>
    %c0_17 = arith.constant 0 : index
    %c0_18 = arith.constant 0 : index
    %24 = vector.load %arg7[%c0_17, %c0_18] : memref<1x512xf32, #tpu.memory_space<vmem>>, vector<1x512xf32>
    %25 = vector.broadcast %24 : vector<1x512xf32> to vector<10x512xf32>
    %26 = arith.addf %23, %25 : vector<10x512xf32>
    %cst_19 = arith.constant 0.000000e+00 : f32
    %27 = vector.broadcast %cst_19 : f32 to vector<10x512xf32>
    %28 = arith.maximumf %26, %27 : vector<10x512xf32>
    %29 = arith.truncf %28 : vector<10x512xf32> to vector<10x512xbf16>
    %c0_20 = arith.constant 0 : index
    %c0_21 = arith.constant 0 : index
    %30 = vector.load %arg8[%c0_20, %c0_21] : memref<512x64xbf16, #tpu.memory_space<vmem>>, vector<512x64xbf16>
    %cst_22 = arith.constant dense<0.000000e+00> : vector<10x64xf32>
    %31 = tpu.matmul %29, %30, %cst_22 {dimension_numbers = #tpu.dot_dimension_numbers<[1], [0], [0], [1], [0, 0, 1, 1], [], []>} : vector<10x512xbf16>, vector<512x64xbf16>, vector<10x64xf32> -> vector<10x64xf32>
    %c0_23 = arith.constant 0 : index
    %c0_24 = arith.constant 0 : index
    %32 = vector.load %arg9[%c0_23, %c0_24] : memref<1x64xf32, #tpu.memory_space<vmem>>, vector<1x64xf32>
    %33 = vector.broadcast %32 : vector<1x64xf32> to vector<10x64xf32>
    %34 = arith.addf %31, %33 : vector<10x64xf32>
    %c0_25 = arith.constant 0 : index
    %c0_26 = arith.constant 0 : index
    %c0_27 = arith.constant 0 : index
    %35 = vector.load %arg10[%c0_25, %c0_26, %c0_27] : memref<1x10x64xf32, #tpu.memory_space<vmem>>, vector<1x10x64xf32>
    %36 = vector.shape_cast %35 : vector<1x10x64xf32> to vector<10x64xf32>
    %37 = vector.shape_cast %34 : vector<10x64xf32> to vector<1x10x64xf32>
    tpu.vector_store %arg10[%c0_25, %c0_26, %c0_27], %37 {strides = array<i32>} : memref<1x10x64xf32, #tpu.memory_space<vmem>>, vector<1x10x64xf32>,
    return
  }
  func.func @transform_0(%arg0: i32) -> (i32, i32, i32) {
    %c0_i32 = arith.constant 0 : i32
    %c0_i32_0 = arith.constant 0 : i32
    %c0_i32_1 = arith.constant 0 : i32
    return %arg0, %c0_i32, %c0_i32_0 : i32, i32, i32
  }
  func.func @transform_1(%arg0: i32) -> (i32, i32) {
    %c0_i32 = arith.constant 0 : i32
    %c0_i32_0 = arith.constant 0 : i32
    %c0_i32_1 = arith.constant 0 : i32
    return %c0_i32, %c0_i32_0 : i32, i32
  }
  func.func @transform_2(%arg0: i32) -> (i32, i32) {
    %c0_i32 = arith.constant 0 : i32
    %c0_i32_0 = arith.constant 0 : i32
    %c0_i32_1 = arith.constant 0 : i32
    return %c0_i32, %c0_i32_0 : i32, i32
  }
  func.func @transform_3(%arg0: i32) -> (i32, i32) {
    %c0_i32 = arith.constant 0 : i32
    %c0_i32_0 = arith.constant 0 : i32
    %c0_i32_1 = arith.constant 0 : i32
    return %c0_i32, %c0_i32_0 : i32, i32
  }
  func.func @transform_4(%arg0: i32) -> (i32, i32) {
    %c0_i32 = arith.constant 0 : i32
    %c0_i32_0 = arith.constant 0 : i32
    %c0_i32_1 = arith.constant 0 : i32
    return %c0_i32, %c0_i32_0 : i32, i32
  }
  func.func @transform_5(%arg0: i32) -> (i32, i32) {
    %c0_i32 = arith.constant 0 : i32
    %c0_i32_0 = arith.constant 0 : i32
    %c0_i32_1 = arith.constant 0 : i32
    return %c0_i32, %c0_i32_0 : i32, i32
  }
  func.func @transform_6(%arg0: i32) -> (i32, i32) {
    %c0_i32 = arith.constant 0 : i32
    %c0_i32_0 = arith.constant 0 : i32
    %c0_i32_1 = arith.constant 0 : i32
    return %c0_i32, %c0_i32_0 : i32, i32
  }
  func.func @transform_7(%arg0: i32) -> (i32, i32) {
    %c0_i32 = arith.constant 0 : i32
    %c0_i32_0 = arith.constant 0 : i32
    %c0_i32_1 = arith.constant 0 : i32
    return %c0_i32, %c0_i32_0 : i32, i32
  }
  func.func @transform_8(%arg0: i32) -> (i32, i32) {
    %c0_i32 = arith.constant 0 : i32
    %c0_i32_0 = arith.constant 0 : i32
    %c0_i32_1 = arith.constant 0 : i32
    return %c0_i32, %c0_i32_0 : i32, i32
  }
  func.func @transform_9(%arg0: i32) -> (i32, i32, i32) {
    %c0_i32 = arith.constant 0 : i32
    %c0_i32_0 = arith.constant 0 : i32
    %c0_i32_1 = arith.constant 0 : i32
    return %arg0, %c0_i32, %c0_i32_0 : i32, i32, i32
  }
}

</mosaic_0001>

<bundles_post_ra>
// kernel: decoder_forward.1
= control target key start
LH: loop header
LB: loop body
LE: loop exit
PB: predicated region body
PF: predicated region fallthrough
CT: control target
= control target key end

     0   :  { %s1574_s30 = smov 0   ;;  %s1935_s0 = inlined_call_operand.vmem [shape: bf16[2,9,8], index: 0, kind: input, shape index: {}]   ;;  %s1936_s1 = inlined_call_operand.vmem [shape: bf16[8,64], index: 1, kind: input, shape index: {}]   ;;  %s1937_s2 = inlined_call_operand.vmem [shape: f32[1,64], index: 2, kind: input, shape index: {}]   ;;  %s1938_s3 = inlined_call_operand.vmem [shape: bf16[128,128], index: 3, kind: input, shape index: {}]   ;;  %s1939_s4 = inlined_call_operand.vmem [shape: f32[1,128], index: 4, kind: input, shape index: {}]   ;;  %s1940_s5 = inlined_call_operand.vmem [shape: bf16[128,512], index: 5, kind: input, shape index: {}]   ;;  %s1941_s6 = inlined_call_operand.vmem [shape: f32[1,512], index: 6, kind: input, shape index: {}]   ;;  %s1942_s7 = inlined_call_operand.vmem [shape: bf16[512,64], index: 7, kind: input, shape index: {}]   ;;  %s1943_s8 = inlined_call_operand.vmem [shape: f32[1,64], index: 8, kind: input, shape index: {}]   ;;  %s1944_s9 = inlined_call_operand.vmem [shape: f32[2,10,64], index: 9, kind: output, shape index: {}]  }
   0x1 LB: > { %s1119_s10 = sadd.s32 4294967295, %s1521_s30   ;;  %p1123_p0 = scmp.ge.s32.totalorder %s1521_s30, 1  ;;  %s1521_s30 = sphi %s1574_s30, %s19_s30  }
   0x2   : > { %p287_p1 = scmp.lt.s32.totalorder %s1521_s30, 3 }
   0x4   : > { %p288_p2 = pnand %p1123_p0, %p287_p1 }
   0x5   : > { %p323_p3 = scmp.lt.s32.totalorder (!%p288_p2), %s1119_s10, 1  ;;  %s1523_s14 = smov (!%p288_p2), 64  }
   0x6   : > { %291 = sbr.rel (%p288_p2) target bundleno = 715 (0x2cb), region = 56 }
   0xb   : > { %v336_v0 = vld [vmem:[%s1936_s1] sm:$0xf]  ;;  %vm350_vm0 = vcmask 1043456   ;;  %s1946_s10 = smov (!%p323_p3, %s1119_s10), 1  ;;  %vm346_vm1 = vcmask 64512   ;;  %v1433_v5 = vld [vmem:[%s1938_s3 + $0x38] sm:$0xff] }
   0xc   : > { %v352_v1 = vsel %vm350_vm0, %v336_v0, 0  ;;  %s1423_s13 = sshll.u32 %s1946_s10, 3  ;;  %458 = vmatpush.bf16.msra.mxu1 %v1433_v5  ;;  %v1432_v6 = vld [vmem:[%s1938_s3 + $0x30] sm:$0xff]  ;;  %v1431_v7 = vld [vmem:[%s1938_s3 + $0x28] sm:$0xff]  ;;  %v1430_v8 = vld [vmem:[%s1938_s3 + $0x20] sm:$0xff]  ;;  %vm370_vm2 = vcmask 1040384  }
   0xd   : > { %361 = vmatpush.bf16.msra.mxu0 %v352_v1  ;;  %s327_s16 = scalar_lea.vmem %s1935_s0, %s1423_s13  ;;  %v1512_v9 = vld [vmem:[%s1937_s2] ss:$0 sm:$0xff]  ;;  %v1429_v11 = vld [vmem:[%s1938_s3 + $0x18] sm:$0xff]  ;;  %v1428_v13 = vld [vmem:[%s1938_s3 + $0x10] sm:$0xff]  ;;  %vm386_vm3 = vcmask 523264   ;;  %s1424_s25 = sshll.u32 %s1946_s10, 4 }
   0xe   : > { %v1130_v2 = vld [vmem:[%s327_s16] sm:$0xf]  ;;  %v1425_v3 = vld [vmem:[%s327_s16] sm:$0x10]  ;;  %v1427_v16 = vld [vmem:[%s1938_s3 + $0x8] sm:$0xff]  ;;  %s332_s28 = scalar_lea.vmem %s1944_s9, %s1424_s25  ;;  %vm1062_vm4 = vcmask 517120  }
   0xf   : > { %v1131_v4 = vor.u32 %v1425_v3, %v1130_v2  ;;  %v1426_v25 = vld [vmem:[%s1938_s3] sm:$0xff]  ;;  %v1464_v27 = vld [vmem:[%s1940_s5 + $0xec] sm:$0xf0]  ;;  %v1281_v30 = vld [vmem:[%s1940_s5 + $0xf0] sm:$0xf0] }
  0x10   : > { %459 = vmatpush.bf16.msra.mxu1 %v1432_v6  ;;  %v1279_v26 = vld [vmem:[%s1940_s5 + $0xe0] sm:$0xf]  ;;  %v1462_v28 = vld [vmem:[%s1940_s5 + $0xe4] sm:$0xf]  ;;  %v1287_v31 = vld [vmem:[%s1940_s5 + $0xe8] sm:$0xf] }
  0x11   : > { %1132 = vmatmul.msk.bf16.vlgmr.msra.gmra.mxu0 %vm346_vm1, %v1131_v4  ;;  %v1280_v29 = vor.u32 %v1464_v27, %v1279_v26  ;;  %v1465_v32 = vld [vmem:[%s1940_s5 + $0xf4] sm:$0xf0]  ;;  %v1284_v33 = vor.u32 %v1462_v28, %v1281_v30  ;;  %v1463_v35 = vld [vmem:[%s1940_s5 + $0xec] sm:$0xf]  ;;  %v1289_v36 = vld [vmem:[%s1940_s5 + $0xf8] sm:$0xf0] }
  0x12   : > { %v1288_v34 = vor.u32 %v1465_v32, %v1287_v31  ;;  %v1263_v37 = vld [vmem:[%s1940_s5 + $0xc0] sm:$0xf]  ;;  %v1292_v38 = vor.u32 %v1463_v35, %v1289_v36  ;;  %v1460_v39 = vld [vmem:[%s1940_s5 + $0xcc] sm:$0xf0]  ;;  %v1458_v40 = vld [vmem:[%s1940_s5 + $0xc4] sm:$0xf] }
  0x13   : > { %677 = vmatpush.bf16.msra.mxu2 %v1280_v29  ;;  %v1265_v41 = vld [vmem:[%s1940_s5 + $0xd0] sm:$0xf0]  ;;  %691 = vmatpush.bf16.msra.mxu3 %v1284_v33  ;;  %v1264_v42 = vor.u32 %v1460_v39, %v1263_v37  ;;  %v1271_v44 = vld [vmem:[%s1940_s5 + $0xc8] sm:$0xf]  ;;  %v1461_v45 = vld [vmem:[%s1940_s5 + $0xd4] sm:$0xf0] }
  0x14   : > { %460 = vmatpush.bf16.msra.mxu1 %v1431_v7  ;;  %705 = vmatpush.bf16.msrb.mxu0 %v1288_v34  ;;  %v1268_v43 = vor.u32 %v1458_v40, %v1265_v41  ;;  %v1459_v46 = vld [vmem:[%s1940_s5 + $0xcc] sm:$0xf]  ;;  %v1272_v47 = vor.u32 %v1461_v45, %v1271_v44  ;;  %v1273_v48 = vld [vmem:[%s1940_s5 + $0xd8] sm:$0xf0]  ;;  %v1247_v49 = vld [vmem:[%s1940_s5 + $0xa0] sm:$0xf] }
  0x15   : > { %v1456_v50 = vld [vmem:[%s1940_s5 + $0xac] sm:$0xf0]  ;;  %v1276_v51 = vor.u32 %v1459_v46, %v1273_v48  ;;  %v1454_v52 = vld [vmem:[%s1940_s5 + $0xa4] sm:$0xf]  ;;  %v1249_v53 = vld [vmem:[%s1940_s5 + $0xb0] sm:$0xf0] }
  0x16   : > { %v1255_v54 = vld [vmem:[%s1940_s5 + $0xa8] sm:$0xf]  ;;  %v1248_v55 = vor.u32 %v1456_v50, %v1247_v49  ;;  %v1457_v56 = vld [vmem:[%s1940_s5 + $0xb4] sm:$0xf0]  ;;  %v1455_v57 = vld [vmem:[%s1940_s5 + $0xac] sm:$0xf]  ;;  %v1252_v59 = vor.u32 %v1454_v52, %v1249_v53 }
  0x17   : > { %678 = vmatpush.bf16.msra.mxu2 %v1264_v42  ;;  %v1257_v58 = vld [vmem:[%s1940_s5 + $0xb8] sm:$0xf0]  ;;  %692 = vmatpush.bf16.msra.mxu3 %v1268_v43  ;;  %v1256_v60 = vor.u32 %v1457_v56, %v1255_v54  ;;  %v1231_v61 = vld [vmem:[%s1940_s5 + $0x80] sm:$0xf]  ;;  %v1452_v62 = vld [vmem:[%s1940_s5 + $0x8c] sm:$0xf0] }
  0x18   : > { %461 = vmatpush.bf16.msra.mxu1 %v1430_v8  ;;  %706 = vmatpush.bf16.msrb.mxu0 %v1272_v47  ;;  %v1450_v63 = vld [vmem:[%s1940_s5 + $0x84] sm:$0xf]  ;;  %v1260_v0 = vor.u32 %v1455_v57, %v1257_v58  ;;  %v1233_v1 = vld [vmem:[%s1940_s5 + $0x90] sm:$0xf0]  ;;  %v1239_v2 = vld [vmem:[%s1940_s5 + $0x88] sm:$0xf]  ;;  %v1232_v6 = vor.u32 %v1452_v62, %v1231_v61 }
  0x19   : > { %v1453_v3 = vld [vmem:[%s1940_s5 + $0x94] sm:$0xf0]  ;;  %v1451_v4 = vld [vmem:[%s1940_s5 + $0x8c] sm:$0xf]  ;;  %v1241_v5 = vld [vmem:[%s1940_s5 + $0x98] sm:$0xf0]  ;;  %v1236_v7 = vor.u32 %v1450_v63, %v1233_v1 }
  0x1a   : > { %v1240_v8 = vor.u32 %v1453_v3, %v1239_v2  ;;  %v1225_v26 = vld [vmem:[%s1940_s5 + $0x78] sm:$0xf0]  ;;  %v1199_v28 = vld [vmem:[%s1940_s5 + $0x40] sm:$0xf]  ;;  %v1444_v29 = vld [vmem:[%s1940_s5 + $0x4c] sm:$0xf0] }
  0x1b   : > { %679 = vmatpush.bf16.msra.mxu2 %v1248_v55  ;;  %693 = vmatpush.bf16.msra.mxu3 %v1252_v59  ;;  %v1442_v30 = vld [vmem:[%s1940_s5 + $0x44] sm:$0xf]  ;;  %v1200_v31 = vor.u32 %v1444_v29, %v1199_v28  ;;  %v1201_v32 = vld [vmem:[%s1940_s5 + $0x50] sm:$0xf0]  ;;  %v1207_v33 = vld [vmem:[%s1940_s5 + $0x48] sm:$0xf] }
  0x1c   : > { %462 = vmatpush.bf16.msra.mxu1 %v1429_v11  ;;  %707 = vmatpush.bf16.msrb.mxu0 %v1256_v60  ;;  %v1445_v34 = vld [vmem:[%s1940_s5 + $0x54] sm:$0xf0]  ;;  %v1204_v35 = vor.u32 %v1442_v30, %v1201_v32  ;;  %v1443_v37 = vld [vmem:[%s1940_s5 + $0x4c] sm:$0xf]  ;;  %v1183_v40 = vld [vmem:[%s1940_s5 + $0x20] sm:$0xf] }
  0x1d   : > { %v1208_v36 = vor.u32 %v1445_v34, %v1207_v33  ;;  %v1440_v41 = vld [vmem:[%s1940_s5 + $0x2c] sm:$0xf0]  ;;  %v1438_v42 = vld [vmem:[%s1940_s5 + $0x24] sm:$0xf]  ;;  %v1185_v44 = vld [vmem:[%s1940_s5 + $0x30] sm:$0xf0] }
  0x1e   : > { %v1184_v43 = vor.u32 %v1440_v41, %v1183_v40  ;;  %v1191_v45 = vld [vmem:[%s1940_s5 + $0x28] sm:$0xf]  ;;  %v1441_v46 = vld [vmem:[%s1940_s5 + $0x34] sm:$0xf0]  ;;  %v1188_v47 = vor.u32 %v1438_v42, %v1185_v44  ;;  %v1439_v49 = vld [vmem:[%s1940_s5 + $0x2c] sm:$0xf] }
  0x1f   : > { %680 = vmatpush.bf16.msra.mxu2 %v1232_v6  ;;  %694 = vmatpush.bf16.msra.mxu3 %v1236_v7  ;;  %v1192_v48 = vor.u32 %v1441_v46, %v1191_v45  ;;  %v1193_v50 = vld [vmem:[%s1940_s5 + $0x38] sm:$0xf0]  ;;  %v1167_v52 = vld [vmem:[%s1940_s5] sm:$0xf]  ;;  %v1436_v53 = vld [vmem:[%s1940_s5 + $0xc] sm:$0xf0] }
  0x20   : > { %463 = vmatpush.bf16.msra.mxu1 %v1428_v13  ;;  %708 = vmatpush.bf16.msrb.mxu0 %v1240_v8  ;;  %v1434_v54 = vld [vmem:[%s1940_s5 + $0x4] sm:$0xf]  ;;  %v1168_v55 = vor.u32 %v1436_v53, %v1167_v52  ;;  %v1169_v56 = vld [vmem:[%s1940_s5 + $0x10] sm:$0xf0]  ;;  %v1175_v57 = vld [vmem:[%s1940_s5 + $0x8] sm:$0xf] }
  0x21   : > { %v1437_v58 = vld [vmem:[%s1940_s5 + $0x14] sm:$0xf0]  ;;  %v1172_v59 = vor.u32 %v1434_v54, %v1169_v56  ;;  %v1435_v61 = vld [vmem:[%s1940_s5 + $0xc] sm:$0xf]  ;;  %v1177_v62 = vld [vmem:[%s1940_s5 + $0x18] sm:$0xf0] }
  0x22   : > { %v1176_v60 = vor.u32 %v1437_v58, %v1175_v57  ;;  %v1180_v63 = vor.u32 %v1435_v61, %v1177_v62  ;;  %v1497_v1 = vld [vmem:[%s1942_s7 + $0xf8] sm:$0xff]  ;;  %v1472_v6 = vld [vmem:[%s1942_s7 + $0x30] sm:$0xff]  ;;  %v1487_v8 = vld [vmem:[%s1942_s7 + $0xa8] sm:$0xff] }
  0x23   : > { %v1473_v2 = vld [vmem:[%s1942_s7 + $0x38] sm:$0xff]  ;;  %v1480_v7 = vld [vmem:[%s1942_s7 + $0x70] sm:$0xff]  ;;  %v1483_v30 = vld [vmem:[%s1942_s7 + $0x88] sm:$0xff] }
  0x24   : > { %464 = vmatpush.bf16.msra.mxu1 %v1427_v16  ;;  %v1481_v3 = vld [vmem:[%s1942_s7 + $0x78] sm:$0xff]  ;;  %v1468_v32 = vld [vmem:[%s1942_s7 + $0x10] sm:$0xff]  ;;  %v1482_v34 = vld [vmem:[%s1942_s7 + $0x80] sm:$0xff] }
  0x25   : > { %v1469_v28 = vld [vmem:[%s1942_s7 + $0x18] sm:$0xff]  ;;  %v1476_v33 = vld [vmem:[%s1942_s7 + $0x50] sm:$0xff]  ;;  %v507_v40 = vld [vmem:[%s1941_s6] sm:$0xf] }
  0x26   : > { %v1477_v29 = vld [vmem:[%s1942_s7 + $0x58] sm:$0xff]  ;;  %v512_v44 = vperm.slane %v507_v40, 3 }
  0x28   : > { %465 = vmatpush.bf16.msra.mxu1 %v1426_v25  ;;  %v1447_v25 = vld [vmem:[%s1940_s5 + $0x6c] sm:$0xf] }
  0x29   : > { %v1228_v27 = vor.u32 %v1447_v25, %v1225_v26  ;;  %v1478_v25 = vld [vmem:[%s1942_s7 + $0x60] sm:$0xff]  ;;  %v1484_v26 = vld [vmem:[%s1942_s7 + $0x90] sm:$0xff] }
  0x2c   : > { %719 = vmatpush.bf16.msrb.mxu1 %v1292_v38  ;;  %v1209_v38 = vld [vmem:[%s1940_s5 + $0x58] sm:$0xf0] }
  0x2d   : > { %v1212_v39 = vor.u32 %v1443_v37, %v1209_v38  ;;  %v1475_v37 = vld [vmem:[%s1942_s7 + $0x48] sm:$0xff]  ;;  %v1466_v38 = vld [vmem:[%s1942_s7] sm:$0xff] }
  0x30   : > { %720 = vmatpush.bf16.msrb.mxu1 %v1276_v51  ;;  %v1196_v51 = vor.u32 %v1439_v49, %v1193_v50  ;;  %v509_v49 = vperm.slane %v507_v40, 0  ;;  %v510_v50 = vperm.slane %v507_v40, 1 }
  0x34   : > { %721 = vmatpush.bf16.msrb.mxu1 %v1260_v0  ;;  %v1489_v0 = vld [vmem:[%s1942_s7 + $0xb8] sm:$0xff] }
  0x8e   : > { %v363_v10 = vpop.f32.mrf.mxu0 }
  0x8f   : > { %v1609_v12 = vadd.f32 %v1512_v9, %v363_v10 }
  0x91   : > { %v368_v14 = vmax.f32 %v1609_v12, 0.0 }
  0x93   : > { %v374_v18 = vrot.slane %v368_v14, 7 }
  0x95   : > { %v378_v23 = vsel %vm370_vm2, 0.0, %v374_v18 }
  0x96   : > { %v365_v15 = vpop.f32.mrf.mxu0 }
  0x97   : > { %v366_v17 = vadd.f32 %v1512_v9, %v365_v15  ;;  %v1244_v9 = vor.u32 %v1451_v4, %v1241_v5  ;;  %v1488_v4 = vld [vmem:[%s1942_s7 + $0xb0] sm:$0xff] }
  0x98   : > { %v1496_v5 = vld [vmem:[%s1942_s7 + $0xf0] sm:$0xff] }
  0x99   : > { %v369_v19 = vmax.f32 %v366_v17, 0.0  ;;  %722 = vmatpush.bf16.msrb.mxu1 %v1244_v9  ;;  %v1495_v9 = vld [vmem:[%s1942_s7 + $0xe8] sm:$0xff] }
  0x9b   : > { %v1620_v20 = vsel %vm370_vm2, %v369_v19, 0.0  ;;  %v375_v21 = vrot.slane %v369_v19, 7  ;;  %v1448_v19 = vld [vmem:[%s1940_s5 + $0x6c] sm:$0xf0] }
  0x9d   : > { %v376_v22 = vsel %vm370_vm2, %v374_v18, %v375_v21  ;;  %v1215_v18 = vld [vmem:[%s1940_s5 + $0x60] sm:$0xf]  ;;  %v1446_v21 = vld [vmem:[%s1940_s5 + $0x64] sm:$0xf]  ;;  %723 = vmatpush.bf16.msrb.mxu1 %v1228_v27  ;;  %v1492_v27 = vld [vmem:[%s1942_s7 + $0xd0] sm:$0xff] }
  0x9e   : > { %v1507_v24 = vpack.i.bf16 %v376_v22, %v378_v23  ;;  %v1216_v12 = vor.u32 %v1448_v19, %v1215_v18  ;;  %v1449_v22 = vld [vmem:[%s1940_s5 + $0x74] sm:$0xf0] }
  0xa0   : > { %1508 = vrot.lane.b32.xlu0 %v1507_v24, %s1523_s14  ;;  %681 = vmatpush.bf16.msra.mxu2 %v1216_v12 }
  0xa1   : > { %724 = vmatpush.bf16.msrb.mxu1 %v1212_v39  ;;  %v1474_v39 = vld [vmem:[%s1942_s7 + $0x40] sm:$0xff] }
  0xa4   : > { %682 = vmatpush.bf16.msra.mxu2 %v1200_v31  ;;  %v1491_v31 = vld [vmem:[%s1942_s7 + $0xc8] sm:$0xff] }
  0xa5   : > { %725 = vmatpush.bf16.msrb.mxu1 %v1196_v51 }
  0xa8   : > { %683 = vmatpush.bf16.msra.mxu2 %v1184_v43  ;;  %v511_v43 = vperm.slane %v507_v40, 2 }
  0xa9   : > { %726 = vmatpush.bf16.msrb.mxu1 %v1180_v63 }
  0xac   : > { %684 = vmatpush.bf16.msra.mxu2 %v1168_v55 }
  0xb0   : > { %1005 = vmatpush.bf16.msrb.mxu2 %v1473_v2 }
  0xb4   : > { %1006 = vmatpush.bf16.msrb.mxu2 %v1472_v6 }
 0x112   : > { %v1509_v10 = vpop.permute.xlu0 %1508 }
 0x113   : > { %v1511_v11 = vunpack.i.h.bf16 %v1509_v10  ;;  %v1510_v13 = vunpack.i.l.bf16 %v1509_v10  ;;  %v1471_v10 = vld [vmem:[%s1942_s7 + $0x28] sm:$0xff] }
 0x114   : > { %1007 = vmatpush.bf16.msrb.mxu2 %v1471_v10 }
 0x115   : > { %v387_v15 = vsel %vm386_vm3, %v368_v14, %v1510_v13  ;;  %v388_v16 = vsel %vm386_vm3, %v1620_v20, %v1511_v11  ;;  %v1217_v14 = vld [vmem:[%s1940_s5 + $0x70] sm:$0xf0]  ;;  %v1223_v20 = vld [vmem:[%s1940_s5 + $0x68] sm:$0xf]  ;;  %v1486_v13 = vld [vmem:[%s1942_s7 + $0xa0] sm:$0xff] }
 0x116   : > { %v389_v17 = vpack.c.bf16 %v388_v16, %v387_v15  ;;  %v1220_v23 = vor.u32 %v1446_v21, %v1217_v14  ;;  %v1224_v24 = vor.u32 %v1449_v22, %v1223_v20  ;;  %v1479_v11 = vld [vmem:[%s1942_s7 + $0x68] sm:$0xff]  ;;  %v1494_v15 = vld [vmem:[%s1942_s7 + $0xe0] sm:$0xff]  ;;  %v1485_v22 = vld [vmem:[%s1942_s7 + $0x98] sm:$0xff] }
 0x118   : > { %466 = vmatmul.bf16.vlgmr.msra.gmra.mxu1 %v389_v17  ;;  %695 = vmatpush.bf16.msra.mxu3 %v1220_v23  ;;  %v1513_v17 = vld [vmem:[%s1939_s4] ss:$0 sm:$0xff]  ;;  %v1493_v23 = vld [vmem:[%s1942_s7 + $0xd8] sm:$0xff] }
 0x119   : > { %709 = vmatpush.bf16.msrb.mxu0 %v1224_v24  ;;  %1047 = vmatpush.bf16.msra.mxu1 %v1497_v1  ;;  %v1470_v24 = vld [vmem:[%s1942_s7 + $0x20] sm:$0xff] }
 0x11a   : > { %1008 = vmatpush.bf16.msrb.mxu2 %v1470_v24 }
 0x11c   : > { %696 = vmatpush.bf16.msra.mxu3 %v1204_v35  ;;  %v1490_v35 = vld [vmem:[%s1942_s7 + $0xc0] sm:$0xff] }
 0x11d   : > { %710 = vmatpush.bf16.msrb.mxu0 %v1208_v36  ;;  %1048 = vmatpush.bf16.msra.mxu1 %v1496_v5  ;;  %v1467_v36 = vld [vmem:[%s1942_s7 + $0x8] sm:$0xff] }
 0x11e   : > { %1009 = vmatpush.bf16.msrb.mxu2 %v1469_v28 }
 0x120   : > { %697 = vmatpush.bf16.msra.mxu3 %v1188_v47 }
 0x121   : > { %711 = vmatpush.bf16.msrb.mxu0 %v1192_v48  ;;  %1049 = vmatpush.bf16.msra.mxu1 %v1495_v9  ;;  %v1514_v9 = vld [vmem:[%s1943_s8] ss:$0 sm:$0xff] }
 0x122   : > { %1010 = vmatpush.bf16.msrb.mxu2 %v1468_v32 }
 0x124   : > { %698 = vmatpush.bf16.msra.mxu3 %v1172_v59 }
 0x125   : > { %712 = vmatpush.bf16.msrb.mxu0 %v1176_v60  ;;  %1050 = vmatpush.bf16.msra.mxu1 %v1494_v15 }
 0x126   : > { %1011 = vmatpush.bf16.msrb.mxu2 %v1467_v36 }
 0x128   : > { %1019 = vmatpush.bf16.msrb.mxu3 %v1481_v3 }
 0x129   : > { %1033 = vmatpush.bf16.msra.mxu0 %v1489_v0  ;;  %1051 = vmatpush.bf16.msra.mxu1 %v1493_v23 }
 0x12a   : > { %1012 = vmatpush.bf16.msrb.mxu2 %v1466_v38 }
 0x12c   : > { %1020 = vmatpush.bf16.msrb.mxu3 %v1480_v7 }
 0x12d   : > { %1034 = vmatpush.bf16.msra.mxu0 %v1488_v4  ;;  %1052 = vmatpush.bf16.msra.mxu1 %v1492_v27 }
 0x130   : > { %1021 = vmatpush.bf16.msrb.mxu3 %v1479_v11 }
 0x131   : > { %1035 = vmatpush.bf16.msra.mxu0 %v1487_v8  ;;  %1053 = vmatpush.bf16.msra.mxu1 %v1491_v31 }
 0x134   : > { %1022 = vmatpush.bf16.msrb.mxu3 %v1478_v25 }
 0x135   : > { %1036 = vmatpush.bf16.msra.mxu0 %v1486_v13  ;;  %1054 = vmatpush.bf16.msra.mxu1 %v1490_v35 }
 0x138   : > { %1023 = vmatpush.bf16.msrb.mxu3 %v1477_v29 }
 0x139   : > { %1037 = vmatpush.bf16.msra.mxu0 %v1485_v22 }
 0x13c   : > { %1024 = vmatpush.bf16.msrb.mxu3 %v1476_v33 }
 0x13d   : > { %1038 = vmatpush.bf16.msra.mxu0 %v1484_v26 }
 0x140   : > { %1025 = vmatpush.bf16.msrb.mxu3 %v1475_v37 }
 0x141   : > { %1039 = vmatpush.bf16.msra.mxu0 %v1483_v30 }
 0x144   : > { %1026 = vmatpush.bf16.msrb.mxu3 %v1474_v39 }
 0x145   : > { %1040 = vmatpush.bf16.msra.mxu0 %v1482_v34 }
 0x195   : > { %v467_v16 = vpop.f32.mrf.mxu1 }
 0x196   : > { %v468_v18 = vadd.f32 %v1513_v17, %v467_v16 }
 0x198   : > { %v472_v12 = vmax.f32 %v468_v18, 0.0 }
 0x19d   : > { %v469_v19 = vpop.f32.mrf.mxu1 }
 0x19e   : > { %v470_v21 = vadd.f32 %v1513_v17, %v469_v19 }
 0x1a0   : > { %v473_v14 = vmax.f32 %v470_v21, 0.0 }
 0x1a2   : > { %v474_v20 = vpack.c.bf16 %v473_v14, %v472_v12 }
 0x1a4   : > { %685 = vmatmul.bf16.vlgmr.msra.gmra.mxu2 %v474_v20  ;;  %699 = vmatmul.bf16.vlgmr.msra.gmra.mxu3 %v474_v20 }
 0x1a5   : > { %713 = vmatmul.bf16.vlgmr.msrb.gmra.mxu0 %v474_v20  ;;  %727 = vmatmul.bf16.vlgmr.msrb.gmra.mxu1 %v474_v20 }
 0x222   : > { %v714_v41 = vpop.f32.mrf.mxu0  ;;  %v728_v42 = vpop.f32.mrf.mxu1 }
 0x223   : > { %v715_v47 = vadd.f32 %v714_v41, %v511_v43  ;;  %v729_v48 = vadd.f32 %v728_v42, %v512_v44 }
 0x225   : > { %v735_v55 = vmax.f32 %v715_v47, 0.0  ;;  %v736_v56 = vmax.f32 %v729_v48, 0.0 }
 0x227   : > { %v686_v45 = vpop.f32.mrf.mxu2  ;;  %v700_v46 = vpop.f32.mrf.mxu3 }
 0x228   : > { %v687_v59 = vadd.f32 %v686_v45, %v509_v49  ;;  %v701_v60 = vadd.f32 %v700_v46, %v510_v50 }
 0x22a   : > { %v716_v51 = vpop.f32.mrf.mxu0  ;;  %v730_v52 = vpop.f32.mrf.mxu1  ;;  %v733_v3 = vmax.f32 %v687_v59, 0.0  ;;  %v734_v4 = vmax.f32 %v701_v60, 0.0 }
 0x22b   : > { %v717_v53 = vadd.f32 %v716_v51, %v511_v43  ;;  %v731_v54 = vadd.f32 %v730_v52, %v512_v44 }
 0x22d   : > { %v739_v57 = vmax.f32 %v717_v53, 0.0  ;;  %v740_v58 = vmax.f32 %v731_v54, 0.0 }
 0x22f   : > { %v743_v61 = vpack.c.bf16 %v739_v57, %v735_v55  ;;  %v744_v62 = vpack.c.bf16 %v740_v58, %v736_v56  ;;  %v688_v63 = vpop.f32.mrf.mxu2  ;;  %v702_v0 = vpop.f32.mrf.mxu3 }
 0x230   : > { %v689_v1 = vadd.f32 %v688_v63, %v509_v49  ;;  %v703_v2 = vadd.f32 %v702_v0, %v510_v50 }
 0x231   : > { %1041 = vmatmul.bf16.vlgmr.msra.gmra.mxu0 %v743_v61  ;;  %1055 = vmatmul.bf16.vlgmr.msra.gmra.mxu1 %v744_v62 }
 0x232   : > { %v737_v5 = vmax.f32 %v689_v1, 0.0  ;;  %v738_v6 = vmax.f32 %v703_v2, 0.0 }
 0x234   : > { %v741_v7 = vpack.c.bf16 %v737_v5, %v733_v3  ;;  %v742_v8 = vpack.c.bf16 %v738_v6, %v734_v4 }
 0x236   : > { %1013 = vmatmul.bf16.vlgmr.msrb.gmra.mxu2 %v741_v7  ;;  %1027 = vmatmul.bf16.vlgmr.msrb.gmra.mxu3 %v742_v8 }
 0x2ae   : > { %v1042_v15 = vpop.f32.mrf.mxu0  ;;  %v1056_v17 = vpop.f32.mrf.mxu1 }
 0x2b6   : > { %v1044_v22 = vpop.f32.mrf.mxu0  ;;  %v1058_v24 = vpop.f32.mrf.mxu1 }
 0x2b9   : > { %v1014_v10 = vpop.f32.mrf.mxu2  ;;  %v1028_v11 = vpop.f32.mrf.mxu3 }
 0x2ba   : > { %v1015_v13 = vadd.f32 %v1514_v9, %v1014_v10 }
 0x2bc   : > { %v1029_v16 = vadd.f32 %v1028_v11, %v1015_v13 }
 0x2be   : > { %v1043_v18 = vadd.f32 %v1042_v15, %v1029_v16 }
 0x2c0   : > { %v1057_v19 = vadd.f32 %v1056_v17, %v1043_v18 }
 0x2c1   : > { %v1016_v21 = vpop.f32.mrf.mxu2  ;;  %v1030_v14 = vpop.f32.mrf.mxu3 }
 0x2c2   : > { %1061 = vst.msk [vmem:[%s332_s28] sm:$0xff] %vm386_vm3, %v1057_v19  ;;  %v1017_v12 = vadd.f32 %v1514_v9, %v1016_v21 }
 0x2c4   : > { %v1031_v20 = vadd.f32 %v1030_v14, %v1017_v12 }
 0x2c6   : > { %v1045_v23 = vadd.f32 %v1044_v22, %v1031_v20 }
 0x2c8   : > { %v1059_v25 = vadd.f32 %v1058_v24, %v1045_v23 }
 0x2ca   : > { %1063 = vst.msk [vmem:[%s332_s28 + $0x8] sm:$0x3] %vm1062_vm4, %v1059_v25 }
 0x2cb PF: > { %s19_s30 = sadd.s32 1, %s1521_s30  }
 0x2cc   : > { %p16_p4 = scmp.ge.s32.totalorder %s19_s30, 4  }
 0x2ce   :  { %18 = sbr.rel (!%p16_p4) target bundleno = 1 (0x1), region = 86 }

</bundles_post_ra>
